<compile_context>
chip_gen: v5e
topology: v5e:2x2
jax: 0.10.0
libtpu: 0.0.40
codegen_flags: <defaults>
</compile_context>

<pallas_src>
import math
import functools

import jax
import jax.numpy as jnp
from jax.experimental import pallas as pl
from jax.experimental.pallas import tpu as pltpu


# --------------------------------------------------------------------------- #
# Kernel 1: per-head Q/K/V projection, scale folded into Q.
# Grid: (B, q-tiles, H).  Outputs laid out (B, H, T, head_dim) via out_specs.
# --------------------------------------------------------------------------- #
def _qkv_proj_kernel(x_ref, wq_ref, wk_ref, wv_ref, q_ref, k_ref, v_ref, *, scale):
    x = x_ref[0]                                   # (tq, d_in), input dtype (MXU operand)
    q = jnp.dot(x, wq_ref[0], preferred_element_type=jnp.float32) * scale
    k = jnp.dot(x, wk_ref[0], preferred_element_type=jnp.float32)
    v = jnp.dot(x, wv_ref[0], preferred_element_type=jnp.float32)
    q_ref[0, 0] = q.astype(q_ref.dtype)
    k_ref[0, 0] = k.astype(k_ref.dtype)
    v_ref[0, 0] = v.astype(v_ref.dtype)


# --------------------------------------------------------------------------- #
# Kernel 2: flash attention (online softmax), causal.
# Grid: (B, H, q-tiles, kv-tiles); kv-tiles is the reduction ("arbitrary") axis.
# --------------------------------------------------------------------------- #
def _flash_attn_kernel(q_ref, k_ref, v_ref, o_ref, m_sc, l_sc, acc_sc, *, tq, tk):
    qi = pl.program_id(2)
    ki = pl.program_id(3)

    @pl.when(ki == 0)
    def _():
        m_sc[...] = jnp.full_like(m_sc, -jnp.inf)
        l_sc[...] = jnp.zeros_like(l_sc)
        acc_sc[...] = jnp.zeros_like(acc_sc)

    # Skip KV tiles that are entirely above the causal diagonal (~2x FLOP saving).
    @pl.when(ki * tk <= qi * tq + (tq - 1))
    def _():
        q = q_ref[0, 0]                            # (tq, hd), already scaled by 1/sqrt(hd)
        k = k_ref[0, 0]                            # (tk, hd)
        v = v_ref[0, 0]                            # (tk, hd)

        # q @ k^T contracting over head_dim without an explicit transpose.
        s = jax.lax.dot_general(q, k, (((1,), (1,)), ((), ())),
                                preferred_element_type=jnp.float32)   # (tq, tk)

        row = qi * tq + jax.lax.broadcasted_iota(jnp.int32, (tq, tk), 0)
        col = ki * tk + jax.lax.broadcasted_iota(jnp.int32, (tq, tk), 1)
        s = jnp.where(col > row, jnp.float32(-jnp.inf), s)

        m_prev = m_sc[...]
        m_new = jnp.maximum(m_prev, jnp.max(s, axis=-1, keepdims=True))
        alpha = jnp.exp(m_prev - m_new)
        p = jnp.exp(s - m_new)
        l_sc[...] = alpha * l_sc[...] + jnp.sum(p, axis=-1, keepdims=True)
        acc_sc[...] = alpha * acc_sc[...] + jnp.dot(
            p.astype(v.dtype), v, preferred_element_type=jnp.float32)
        m_sc[...] = m_new

    @pl.when(ki == pl.num_programs(3) - 1)
    def _():
        inv_l = pl.reciprocal(l_sc[...], approx=True)       # EUP slot -> ~free
        o_ref[0, 0] = (acc_sc[...] * inv_l).astype(o_ref.dtype)


# --------------------------------------------------------------------------- #
# Kernel 3: output projection, reduced over the head grid axis (no head-merge
# relayout needed).  Grid: (B, q-tiles, H) with H as the reduction axis.
# --------------------------------------------------------------------------- #
def _out_proj_kernel(ctx_ref, wo_ref, bo_ref, out_ref, acc_sc):
    h = pl.program_id(2)

    @pl.when(h == 0)
    def _():
        acc_sc[...] = jnp.zeros_like(acc_sc)

    acc_sc[...] += jnp.dot(ctx_ref[0, 0], wo_ref[0],
                           preferred_element_type=jnp.float32)

    @pl.when(h == pl.num_programs(2) - 1)
    def _():
        out_ref[0] = (acc_sc[...] + bo_ref[...].astype(jnp.float32)).astype(out_ref.dtype)


# --------------------------------------------------------------------------- #
# Wrapper
# --------------------------------------------------------------------------- #
def multi_head_attention(x, w_query, w_key, w_value, w_out, b_out, *,
                         num_heads, block_q=128, block_kv=128):
    """x: (B, T, d_in); w_*: (out, in) PyTorch-Linear layout; b_out: (d_out,)."""
    B, T, d_in = x.shape
    d_out = w_query.shape[0]
    assert d_out % num_heads == 0
    head_dim = d_out // num_heads
    dtype = x.dtype

    tq = min(block_q, T)
    tk = min(block_kv, T)
    assert T % tq == 0 and T % tk == 0, "T must be divisible by the tile sizes"
    nq, nk = T // tq, T // tk

    # (out, in) -> per-head (in, out) slices: (H, d_in, hd) and (H, hd, d_out).
    wq_h = w_query.T.reshape(d_in, num_heads, head_dim).transpose(1, 0, 2)
    wk_h = w_key.T.reshape(d_in, num_heads, head_dim).transpose(1, 0, 2)
    wv_h = w_value.T.reshape(d_in, num_heads, head_dim).transpose(1, 0, 2)
    wo_h = w_out.T.reshape(num_heads, head_dim, d_out)
    bo = b_out.reshape(1, d_out)

    scale = 1.0 / math.sqrt(head_dim)

    # ---- 1) Q/K/V projection ----
    qkv_spec = pltpu.PrefetchScalarGridSpec(
        num_scalar_prefetch=0,
        grid=(B, nq, num_heads),
        in_specs=[
            pl.BlockSpec((1, tq, d_in), lambda b, t, h: (b, t, 0)),
            pl.BlockSpec((1, d_in, head_dim), lambda b, t, h: (h, 0, 0)),
            pl.BlockSpec((1, d_in, head_dim), lambda b, t, h: (h, 0, 0)),
            pl.BlockSpec((1, d_in, head_dim), lambda b, t, h: (h, 0, 0)),
        ],
        out_specs=[
            pl.BlockSpec((1, 1, tq, head_dim), lambda b, t, h: (b, h, t, 0)),
            pl.BlockSpec((1, 1, tq, head_dim), lambda b, t, h: (b, h, t, 0)),
            pl.BlockSpec((1, 1, tq, head_dim), lambda b, t, h: (b, h, t, 0)),
        ],
    )
    q, k, v = pl.pallas_call(
        functools.partial(_qkv_proj_kernel, scale=scale),
        out_shape=(
            jax.ShapeDtypeStruct((B, num_heads, T, head_dim), dtype),
            jax.ShapeDtypeStruct((B, num_heads, T, head_dim), dtype),
            jax.ShapeDtypeStruct((B, num_heads, T, head_dim), dtype),
        ),
        grid_spec=qkv_spec,
        compiler_params=pltpu.CompilerParams(
            dimension_semantics=("parallel", "parallel", "parallel")),
    )(x, wq_h, wk_h, wv_h)

    # ---- 2) flash attention ----
    def kv_index_map(b, h, qi, ki):
        # Clamp to the last causally-relevant KV tile so fully-masked tiles
        # re-use the previously fetched block (no extra DMA).
        last_needed = (qi * tq + (tq - 1)) // tk
        return (b, h, jnp.minimum(ki, last_needed), 0)

    attn_spec = pltpu.PrefetchScalarGridSpec(
        num_scalar_prefetch=0,
        grid=(B, num_heads, nq, nk),
        in_specs=[
            pl.BlockSpec((1, 1, tq, head_dim), lambda b, h, qi, ki: (b, h, qi, 0)),
            pl.BlockSpec((1, 1, tk, head_dim), kv_index_map),
            pl.BlockSpec((1, 1, tk, head_dim), kv_index_map),
        ],
        out_specs=pl.BlockSpec((1, 1, tq, head_dim),
                               lambda b, h, qi, ki: (b, h, qi, 0)),
        scratch_shapes=[
            pltpu.VMEM((tq, 1), jnp.float32),          # running max
            pltpu.VMEM((tq, 1), jnp.float32),          # running denom
            pltpu.VMEM((tq, head_dim), jnp.float32),   # running weighted V
        ],
    )
    ctx = pl.pallas_call(
        functools.partial(_flash_attn_kernel, tq=tq, tk=tk),
        out_shape=jax.ShapeDtypeStruct((B, num_heads, T, head_dim), dtype),
        grid_spec=attn_spec,
        compiler_params=pltpu.CompilerParams(
            dimension_semantics=("parallel", "parallel", "parallel", "arbitrary")),
    )(q, k, v)

    # ---- 3) output projection (+ bias), reducing over heads ----
    proj_spec = pltpu.PrefetchScalarGridSpec(
        num_scalar_prefetch=0,
        grid=(B, nq, num_heads),
        in_specs=[
            pl.BlockSpec((1, 1, tq, head_dim), lambda b, t, h: (b, h, t, 0)),
            pl.BlockSpec((1, head_dim, d_out), lambda b, t, h: (h, 0, 0)),
            pl.BlockSpec((1, d_out), lambda b, t, h: (0, 0)),
        ],
        out_specs=pl.BlockSpec((1, tq, d_out), lambda b, t, h: (b, t, 0)),
        scratch_shapes=[pltpu.VMEM((tq, d_out), jnp.float32)],
    )
    out = pl.pallas_call(
        _out_proj_kernel,
        out_shape=jax.ShapeDtypeStruct((B, T, d_out), dtype),
        grid_spec=proj_spec,
        compiler_params=pltpu.CompilerParams(
            dimension_semantics=("parallel", "parallel", "arbitrary")),
    )(ctx, wo_h, bo)

    return out


# --------------------------------------------------------------------------- #
# Pure-JAX reference (mirror of the PyTorch forward, dropout as identity)
# --------------------------------------------------------------------------- #
def _reference(x, w_query, w_key, w_value, w_out, b_out, *, num_heads):
    B, T, d_in = x.shape
    d_out = w_query.shape[0]
    head_dim = d_out // num_heads

    q = x @ w_query.T
    k = x @ w_key.T
    v = x @ w_value.T
    q = q.reshape(B, T, num_heads, head_dim).transpose(0, 2, 1, 3)
    k = k.reshape(B, T, num_heads, head_dim).transpose(0, 2, 1, 3)
    v = v.reshape(B, T, num_heads, head_dim).transpose(0, 2, 1, 3)

    scores = jnp.einsum('bhtd,bhsd->bhts', q, k) / math.sqrt(head_dim)
    mask = jnp.triu(jnp.ones((T, T), bool), k=1)
    scores = jnp.where(mask[None, None], -jnp.inf, scores)
    attn = jax.nn.softmax(scores, axis=-1)
    ctx = jnp.einsum('bhts,bhsd->bhtd', attn, v)
    ctx = ctx.transpose(0, 2, 1, 3).reshape(B, T, d_out)
    return ctx @ w_out.T + b_out


if __name__ == "__main__":
    def run_case(B, T, d_in, d_out, num_heads, key):
        kx, kq, kk, kv, ko, kb = jax.random.split(key, 6)
        x = jax.random.normal(kx, (B, T, d_in), dtype=jnp.float32)
        # nn.Linear weight layout: (out_features, in_features); qkv_bias=False.
        w_query = jax.random.normal(kq, (d_out, d_in), dtype=jnp.float32) * 0.1
        w_key   = jax.random.normal(kk, (d_out, d_in), dtype=jnp.float32) * 0.1
        w_value = jax.random.normal(kv, (d_out, d_in), dtype=jnp.float32) * 0.1
        w_out   = jax.random.normal(ko, (d_out, d_out), dtype=jnp.float32) * 0.1
        b_out   = jax.random.normal(kb, (d_out,), dtype=jnp.float32) * 0.1

        out = multi_head_attention(x, w_query, w_key, w_value, w_out, b_out,
                                   num_heads=num_heads)
        out = jax.block_until_ready(out)
        ref = _reference(x, w_query, w_key, w_value, w_out, b_out,
                         num_heads=num_heads)
        assert out.shape == (B, T, d_out)
        # tolerance accounts for approx reciprocal in the softmax normalization
        assert jnp.allclose(out, ref, atol=5e-3, rtol=5e-3), "mismatch vs reference"

    # Small, module-consistent shapes (same toy config as the demo module).
    run_case(B=2, T=8, d_in=32, d_out=32, num_heads=4, key=jax.random.PRNGKey(0))
    # Multi-tile case exercising the online-softmax loop and causal tile skipping.
    run_case(B=2, T=256, d_in=64, d_out=64, num_heads=4, key=jax.random.PRNGKey(1))

    print("KERNEL_OK")
</pallas_src>

<mosaic_0001>
module attributes {stable_mosaic.version = 11 : i64} {
  func.func @_qkv_proj_kernel(%arg0: i32, %arg1: i32, %arg2: i32, %arg3: memref<1x8x32xf32, #tpu.memory_space<vmem>>, %arg4: memref<1x32x8xf32, #tpu.memory_space<vmem>>, %arg5: memref<1x32x8xf32, #tpu.memory_space<vmem>>, %arg6: memref<1x32x8xf32, #tpu.memory_space<vmem>>, %arg7: memref<1x1x8x8xf32, #tpu.memory_space<vmem>>, %arg8: memref<1x1x8x8xf32, #tpu.memory_space<vmem>>, %arg9: memref<1x1x8x8xf32, #tpu.memory_space<vmem>>) attributes {dimension_semantics = [#tpu.dimension_semantics<parallel>, #tpu.dimension_semantics<parallel>, #tpu.dimension_semantics<parallel>], iteration_bounds = array<i64: 2, 1, 4>, scalar_prefetch = 0 : i64, scratch_operands = 0 : i64, tpu.core_type = #tpu.core_type<tc>, window_params = [{transform_indices = @transform_0, window_bounds = array<i64: 1, 8, 32>}, {transform_indices = @transform_1, window_bounds = array<i64: 1, 32, 8>}, {transform_indices = @transform_2, window_bounds = array<i64: 1, 32, 8>}, {transform_indices = @transform_3, window_bounds = array<i64: 1, 32, 8>}, {transform_indices = @transform_4, window_bounds = array<i64: 1, 1, 8, 8>}, {transform_indices = @transform_5, window_bounds = array<i64: 1, 1, 8, 8>}, {transform_indices = @transform_6, window_bounds = array<i64: 1, 1, 8, 8>}]} {
    %c0 = arith.constant 0 : index
    %c0_0 = arith.constant 0 : index
    %c0_1 = arith.constant 0 : index
    %0 = vector.load %arg3[%c0, %c0_0, %c0_1] : memref<1x8x32xf32, #tpu.memory_space<vmem>>, vector<1x8x32xf32>
    %1 = vector.shape_cast %0 : vector<1x8x32xf32> to vector<8x32xf32>
    %c0_2 = arith.constant 0 : index
    %c0_3 = arith.constant 0 : index
    %c0_4 = arith.constant 0 : index
    %2 = vector.load %arg4[%c0_2, %c0_3, %c0_4] : memref<1x32x8xf32, #tpu.memory_space<vmem>>, vector<1x32x8xf32>
    %3 = vector.shape_cast %2 : vector<1x32x8xf32> to vector<32x8xf32>
    %cst = arith.constant dense<0.000000e+00> : vector<8x8xf32>
    %4 = tpu.matmul %1, %3, %cst {dimension_numbers = #tpu.dot_dimension_numbers<[1], [0], [0], [1], [0, 0, 1, 1], [], []>} : vector<8x32xf32>, vector<32x8xf32>, vector<8x8xf32> -> vector<8x8xf32>
    %cst_5 = arith.constant 0.353553385 : f32
    %5 = vector.broadcast %cst_5 : f32 to vector<8x8xf32>
    %6 = arith.mulf %4, %5 : vector<8x8xf32>
    %c0_6 = arith.constant 0 : index
    %c0_7 = arith.constant 0 : index
    %c0_8 = arith.constant 0 : index
    %7 = vector.load %arg5[%c0_6, %c0_7, %c0_8] : memref<1x32x8xf32, #tpu.memory_space<vmem>>, vector<1x32x8xf32>
    %8 = vector.shape_cast %7 : vector<1x32x8xf32> to vector<32x8xf32>
    %cst_9 = arith.constant dense<0.000000e+00> : vector<8x8xf32>
    %9 = tpu.matmul %1, %8, %cst_9 {dimension_numbers = #tpu.dot_dimension_numbers<[1], [0], [0], [1], [0, 0, 1, 1], [], []>} : vector<8x32xf32>, vector<32x8xf32>, vector<8x8xf32> -> vector<8x8xf32>
    %c0_10 = arith.constant 0 : index
    %c0_11 = arith.constant 0 : index
    %c0_12 = arith.constant 0 : index
    %10 = vector.load %arg6[%c0_10, %c0_11, %c0_12] : memref<1x32x8xf32, #tpu.memory_space<vmem>>, vector<1x32x8xf32>
    %11 = vector.shape_cast %10 : vector<1x32x8xf32> to vector<32x8xf32>
    %cst_13 = arith.constant dense<0.000000e+00> : vector<8x8xf32>
    %12 = tpu.matmul %1, %11, %cst_13 {dimension_numbers = #tpu.dot_dimension_numbers<[1], [0], [0], [1], [0, 0, 1, 1], [], []>} : vector<8x32xf32>, vector<32x8xf32>, vector<8x8xf32> -> vector<8x8xf32>
    %c0_14 = arith.constant 0 : index
    %c0_15 = arith.constant 0 : index
    %c0_16 = arith.constant 0 : index
    %c0_17 = arith.constant 0 : index
    %13 = vector.load %arg7[%c0_14, %c0_15, %c0_16, %c0_17] : memref<1x1x8x8xf32, #tpu.memory_space<vmem>>, vector<1x1x8x8xf32>
    %14 = vector.shape_cast %13 : vector<1x1x8x8xf32> to vector<8x8xf32>
    %15 = vector.shape_cast %6 : vector<8x8xf32> to vector<1x1x8x8xf32>
    tpu.vector_store %arg7[%c0_14, %c0_15, %c0_16, %c0_17], %15 {strides = array<i32>} : memref<1x1x8x8xf32, #tpu.memory_space<vmem>>, vector<1x1x8x8xf32>,
    %c0_18 = arith.constant 0 : index
    %c0_19 = arith.constant 0 : index
    %c0_20 = arith.constant 0 : index
    %c0_21 = arith.constant 0 : index
    %16 = vector.load %arg8[%c0_18, %c0_19, %c0_20, %c0_21] : memref<1x1x8x8xf32, #tpu.memory_space<vmem>>, vector<1x1x8x8xf32>
    %17 = vector.shape_cast %16 : vector<1x1x8x8xf32> to vector<8x8xf32>
    %18 = vector.shape_cast %9 : vector<8x8xf32> to vector<1x1x8x8xf32>
    tpu.vector_store %arg8[%c0_18, %c0_19, %c0_20, %c0_21], %18 {strides = array<i32>} : memref<1x1x8x8xf32, #tpu.memory_space<vmem>>, vector<1x1x8x8xf32>,
    %c0_22 = arith.constant 0 : index
    %c0_23 = arith.constant 0 : index
    %c0_24 = arith.constant 0 : index
    %c0_25 = arith.constant 0 : index
    %19 = vector.load %arg9[%c0_22, %c0_23, %c0_24, %c0_25] : memref<1x1x8x8xf32, #tpu.memory_space<vmem>>, vector<1x1x8x8xf32>
    %20 = vector.shape_cast %19 : vector<1x1x8x8xf32> to vector<8x8xf32>
    %21 = vector.shape_cast %12 : vector<8x8xf32> to vector<1x1x8x8xf32>
    tpu.vector_store %arg9[%c0_22, %c0_23, %c0_24, %c0_25], %21 {strides = array<i32>} : memref<1x1x8x8xf32, #tpu.memory_space<vmem>>, vector<1x1x8x8xf32>,
    return
  }
  func.func @transform_0(%arg0: i32, %arg1: i32, %arg2: i32) -> (i32, i32, i32) {
    %c0_i32 = arith.constant 0 : i32
    %c0_i32_0 = arith.constant 0 : i32
    return %arg0, %arg1, %c0_i32 : i32, i32, i32
  }
  func.func @transform_1(%arg0: i32, %arg1: i32, %arg2: i32) -> (i32, i32, i32) {
    %c0_i32 = arith.constant 0 : i32
    %c0_i32_0 = arith.constant 0 : i32
    %c0_i32_1 = arith.constant 0 : i32
    return %arg2, %c0_i32, %c0_i32_0 : i32, i32, i32
  }
  func.func @transform_2(%arg0: i32, %arg1: i32, %arg2: i32) -> (i32, i32, i32) {
    %c0_i32 = arith.constant 0 : i32
    %c0_i32_0 = arith.constant 0 : i32
    %c0_i32_1 = arith.constant 0 : i32
    return %arg2, %c0_i32, %c0_i32_0 : i32, i32, i32
  }
  func.func @transform_3(%arg0: i32, %arg1: i32, %arg2: i32) -> (i32, i32, i32) {
    %c0_i32 = arith.constant 0 : i32
    %c0_i32_0 = arith.constant 0 : i32
    %c0_i32_1 = arith.constant 0 : i32
    return %arg2, %c0_i32, %c0_i32_0 : i32, i32, i32
  }
  func.func @transform_4(%arg0: i32, %arg1: i32, %arg2: i32) -> (i32, i32, i32, i32) {
    %c0_i32 = arith.constant 0 : i32
    %c0_i32_0 = arith.constant 0 : i32
    return %arg0, %arg2, %arg1, %c0_i32 : i32, i32, i32, i32
  }
  func.func @transform_5(%arg0: i32, %arg1: i32, %arg2: i32) -> (i32, i32, i32, i32) {
    %c0_i32 = arith.constant 0 : i32
    %c0_i32_0 = arith.constant 0 : i32
    return %arg0, %arg2, %arg1, %c0_i32 : i32, i32, i32, i32
  }
  func.func @transform_6(%arg0: i32, %arg1: i32, %arg2: i32) -> (i32, i32, i32, i32) {
    %c0_i32 = arith.constant 0 : i32
    %c0_i32_0 = arith.constant 0 : i32
    return %arg0, %arg2, %arg1, %c0_i32 : i32, i32, i32, i32
  }
}

</mosaic_0001>

<bundles_post_ra>
// kernel: tpu_custom_call.1
= control target key start
LH: loop header
LB: loop body
LE: loop exit
PB: predicated region body
PF: predicated region fallthrough
CT: control target
= control target key end

     0   :  { %s1222_s0 = inlined_call_operand.vmem [shape: f32[2,8,32], index: 0, kind: input, shape index: {}]   ;;  %s1223_s1 = inlined_call_operand.vmem [shape: f32[4,32,8], index: 1, kind: input, shape index: {}]   ;;  %s1224_s2 = inlined_call_operand.vmem [shape: f32[4,32,8], index: 2, kind: input, shape index: {}]   ;;  %s1225_s3 = inlined_call_operand.vmem [shape: f32[4,32,8], index: 3, kind: input, shape index: {}]   ;;  %s1226_s4 = inlined_call_operand.hbm [shape: f32[2,4,8,8], index: 4, kind: output, shape index: {0}]   ;;  %s1227_s5 = inlined_call_operand.hbm [shape: f32[2,4,8,8], index: 5, kind: output, shape index: {1}]   ;;  %s1228_s6 = inlined_call_operand.hbm [shape: f32[2,4,8,8], index: 6, kind: output, shape index: {2}]  }
   0x1   :  { %1239 = sst [smem:[#allocation13_spill]] %s1222_s0 }
   0x2   :  { %1240 = sst [smem:[#allocation14_spill]] %s1223_s1 }
   0x3   :  { %12 = vsyncpa [#allocation3], 0 }
   0x4   :  { %14 = vsyncpa [#allocation3 + $0x1], 0 }
   0x5   :  { %15 = vsyncpa [#allocation5], 0 }
   0x6   :  { %17 = vsyncpa [#allocation5 + $0x1], 0  ;;  %s1000_s21 = smov 0   ;;  %s1002_s22 = smov 0  }
   0x7   :  { %s1004_s23 = smov 0   ;;  %s1006_s24 = smov 0  }
   0x8   :  { %s1008_s25 = smov 0   ;;  %s1010_s26 = smov 0  }
   0x9   :  { %s1012_s27 = smov 0   ;;  %s1014_s28 = smov 0  }
   0xa LB: > { %s1230_s29 = sadd.s32 4294967295, %s963_s28   ;;  %s1229_s30 = sadd.s32 4294967294, %s963_s28   ;;  %s963_s28 = sphi %s1014_s28, %s23_s28   ;;  %s959_s27 = sphi %s1012_s27, %s1267_s27   ;;  %s955_s26 = sphi %s1010_s26, %s1266_s26   ;;  %s951_s25 = sphi %s1008_s25, %s1265_s25   ;;  %s947_s24 = sphi %s1006_s24, %s1264_s24   ;;  %s943_s23 = sphi %s1004_s23, %s1263_s23   ;;  %s939_s22 = sphi %s1002_s22, %s1262_s22   ;;  %s935_s21 = sphi %s1000_s21, %s1261_s21  }
   0xb   : > { %s35_s7 = sadd.s32 1, %s955_s26  ;;  %s42_s8 = sadd.s32 1, %s959_s27 }
   0xc   : > { %p36_p0 = scmp.ge.s32.totalorder %s35_s7, 4  ;;  %p169_p1 = scmp.ne.s32.totalorder %s943_s23, %s939_s22 }
   0xd   : > { %p170_p2 = scmp.eq.s32.totalorder %s1230_s29, 7  ;;  %p175_p5 = scmp.ne.s32.totalorder %s939_s22, %s935_s21 }
   0xe   : > { %s1269_s7 = smov (%p36_p0, %s35_s7), 0  ;;  %s1271_s8 = smov (!%p36_p0, %s42_s8), %s959_s27 }
   0xf   : > { %1241 = sst [smem:[#allocation9_spill]] %s1269_s7  ;;  %s153_s9 = ssub.s32 %s955_s26, %s1269_s7 }
  0x10   : > { %p1053_p3 = por %p170_p2, %p169_p1  ;;  %p44_p4 = scmp.ge.s32.totalorder %s1271_s8, 2 }
  0x11   : > { %p176_p6 = scmp.eq.s32.totalorder %s1229_s30, 7  ;;  %p700_p7 = scmp.ge.s32.totalorder %s963_s28, 1 }
  0x12   : > { %s1273_s8 = smov (%p44_p4, %s1271_s8), 0  ;;  %p288_p9 = scmp.lt.s32.totalorder %s963_s28, 9 }
  0x13   : > { %1243 = sst [smem:[#allocation10_spill]] %s1273_s8  ;;  %p1064_p8 = por %p176_p6, %p175_p5 }
  0x14   : > { %s152_s12 = ssub.s32 %s959_s27, %s1273_s8  ;;  %s159_s13 = sadd.s32 1, %s943_s23 }
  0x15   : > { %s154_s14 = sor.u32 %s153_s9, %s152_s12  ;;  %p289_p10 = pnand %p700_p7, %p288_p9 }
  0x16   : > { %p157_p11 = scmp.eq.s32.totalorder %s154_s14, 0 }
  0x17   : > { %292 = sbr.rel (%p289_p10) target bundleno = 211 (0xd3), region = 36 }
  0x18   : > { %s1073_s15 = scalar_select %p157_p11, %s943_s23, %s159_s13  }
  0x1c   : > { %p352_p12 = scmp.lt.s32.totalorder %s947_s24, 3  ;;  %p345_p13 = scmp.lt.s32.totalorder %s951_s25, 1  ;;  %vm372_vm0 = vcmask 261120   ;;  %vm445_vm1 = vcmask 64512  }
  0x1d   : > { %s1245_s1 = sld [smem:[#allocation14_spill]]  ;;  %s1247_s9 = sadd.s32 4294967295, %s963_s28  }
  0x1e   : > { %s353_s16 = scalar_select %p352_p12, %s947_s24, 3 }
  0x1f   : > { %s346_s17 = scalar_select %p345_p13, %s951_s25, 1 }
  0x20   : > { %s725_s18 = sshll.u32 %s353_s16, 5  ;;  %s1246_s0 = sld [smem:[#allocation13_spill]] }
  0x21   : > { %s366_s30 = scalar_lea.vmem %s1225_s3, %s725_s18  ;;  %s361_s8 = scalar_lea.vmem %s1224_s2, %s725_s18 }
  0x22   : > { %v424_v0 = vld [vmem:[%s366_s30 + $0x18] sm:$0xff]  ;;  %v423_v1 = vld [vmem:[%s366_s30 + $0x10] sm:$0xff]  ;;  %s704_s7 = sshll.u32 %s346_s17, 3  ;;  %v422_v5 = vld [vmem:[%s366_s30 + $0x8] sm:$0xff] }
  0x23   : > { %s356_s12 = scalar_lea.vmem %s1245_s1, %s725_s18  ;;  %437 = vmatpush.msra.mxu2 %v424_v0  ;;  %v400_v3 = vld [vmem:[%s361_s8 + $0x18] sm:$0xff]  ;;  %v399_v6 = vld [vmem:[%s361_s8 + $0x10] sm:$0xff]  ;;  %v398_v8 = vld [vmem:[%s361_s8 + $0x8] sm:$0xff] }
  0x24   : > { %v371_v2 = vld [vmem:[%s356_s12 + $0x18] sm:$0xff]  ;;  %v370_v4 = vld [vmem:[%s356_s12 + $0x10] sm:$0xff]  ;;  %413 = vmatpush.msra.mxu1 %v400_v3  ;;  %v369_v7 = vld [vmem:[%s356_s12 + $0x8] sm:$0xff] }
  0x25   : > { %388 = vmatpush.msra.mxu0 %v371_v2  ;;  %438 = vmatpush.msra.mxu2 %v423_v1  ;;  %v421_v9 = vld [vmem:[%s366_s30] sm:$0xff]  ;;  %s717_s30 = sshll.u32 %s951_s25, 2 }
  0x26   : > { %s351_s29 = scalar_lea.vmem %s1246_s0, %s704_s7  ;;  %414 = vmatpush.msra.mxu1 %v399_v6  ;;  %v368_v10 = vld [vmem:[%s356_s12] sm:$0xff]  ;;  %s1233_s7 = sand.u32 1, %s939_s22  }
  0x27   : > { %389 = vmatpush.msra.mxu0 %v370_v4  ;;  %439 = vmatpush.msra.mxu2 %v422_v5  ;;  %v367_v11 = vld [vmem:[%s351_s29] sm:$0xff]  ;;  %s1095_s17 = sshll.u32 %s1233_s7, 3  ;;  %s471_s18 = sadd.s32 %s947_s24, %s717_s30 }
  0x28   : > { %415 = vmatpush.msra.mxu1 %v398_v8  ;;  %v397_v12 = vld [vmem:[%s361_s8] sm:$0xff]  ;;  %s718_s20 = sshll.u32 %s471_s18, 3  ;;  %s1100_s8 = sand.u32 1, %s1247_s9  }
  0x29   : > { %390 = vmatpush.msra.mxu0 %v369_v7  ;;  %440 = vmatpush.msra.mxu2 %v421_v9  ;;  %s1234_s12 = scalar_lea.vmem [#allocation6], %s1095_s17  ;;  %s490_s25 = scalar_lea.hbm %s1227_s5, %s718_s20 }
  0x2a   : > { %713 = vmatmul.msk.f32.vlgmr.msra.gmra.mxu2 %vm372_vm0, %v367_v11  ;;  %416 = vmatpush.msra.mxu1 %v397_v12  ;;  %s1105_s13 = sshll.u32 %s1234_s12, 4  ;;  %s473_s7 = scalar_lea.hbm %s1226_s4, %s718_s20 }
  0x2b   : > { %391 = vmatpush.msra.mxu0 %v368_v10  ;;  %712 = vmatmul.msk.f32.vlgmr.msra.gmra.mxu1 %vm372_vm0, %v367_v11  ;;  %1248 = sst [smem:[#allocation11_spill]] %s1105_s13  ;;  %s337_s0 = scalar_lea.vmem [#allocation4], %s1095_s17 }
  0x2c   : > { %711 = vmatmul.msk.f32.vlgmr.msra.gmra.mxu0 %vm372_vm0, %v367_v11  ;;  %s1114_s1 = sshll.u32 %s337_s0, 4  ;;  %s507_s18 = scalar_lea.hbm %s1228_s6, %s718_s20  ;;  %s493_s1 = int_to_ptr.vmem [resolvable:$true] %s1114_s1 }
  0x2d   : > { %s1119_s9 = sshll.u32 %s490_s25, 4  ;;  %s1235_s12 = scalar_lea.vmem [#allocation2], %s1095_s17  ;;  %s495_s9 = int_to_ptr.hbm [resolvable:$true] %s1119_s9 }
  0x2e   : > { %s1124_s14 = sshll.u32 %s1235_s12, 4  ;;  %s1126_s16 = sshll.u32 %s473_s7, 4  ;;  %s476_s14 = int_to_ptr.vmem [resolvable:$true] %s1124_s14  ;;  %s478_s16 = int_to_ptr.hbm [resolvable:$true] %s1126_s16 }
  0x2f   : > { %s1129_s19 = sshll.u32 %s507_s18, 4  ;;  %s455_s20 = scalar_lea.sflag [#allocation5], %s1100_s8 }
  0x30   : > { %1249 = sst [smem:[#allocation12_spill]] %s1129_s19  ;;  %s823_s7 = sshra.s32 %s495_s9, 4  ;;  %s824_s7 = int_to_ptr.hbm [resolvable:$true] %s823_s7 }
  0x31   : > { %s825_s25 = scalar_lea.hbm %s824_s7, 8  ;;  %s829_s30 = scalar_lea.hbm %s1227_s5, 64 }
  0x32   : > { %p826_p0 = scmp.ne.s32.totalorder %s824_s7, %s825_s25  ;;  %p830_p4 = scmp.lt.s32.totalorder %s824_s7, %s1227_s5 }
  0x33   : > { %p831_p5 = scmp.lt.s32.totalorder %s829_s30, %s825_s25 }
  0x34   : > { %p827_p1 = pnand %p826_p0, %p1053_p3 }
  0x35   : > { %p832_p6 = por %p831_p5, %p830_p4 }
  0x36   : > { %p828_p2 = pneg %p827_p1 }
  0x38   : > { %p833_p7 = pnand %p832_p6, %p828_p2 }
  0xa8   : > { %v418_v15 = vpop.f32.mrf.mxu1 }
  0xa9   : > { %v393_v13 = vpop.f32.mrf.mxu0  ;;  %447 = vst.msk [vmem:[%s337_s0] sm:$0xff] %vm445_vm1, %v418_v15 }
  0xaa   : > { %v396_v14 = vmul.f32 0.35355338, %v393_v13 }
  0xab   : > { %836 = shalt.err (!%p833_p7)
}
  0xac   : > { %729 = dma.vmem_to_hbm [thread:$0]  (%p1053_p3), %s493_s1, 128, %s495_s9, %s455_s20  }
  0xad   : > { %s1250_s0 = scalar_lea.vmem [#allocation2], %s1095_s17  ;;  %s1251_s29 = sand.u32 1, %s939_s22  }
  0xae   : > { %446 = vst.msk [vmem:[%s1250_s0] sm:$0xff] %vm445_vm1, %v396_v14  ;;  %s450_s24 = scalar_lea.sflag [#allocation3], %s1251_s29  ;;  %s851_s12 = sshra.s32 %s478_s16, 4  ;;  %s852_s12 = int_to_ptr.hbm [resolvable:$true] %s851_s12 }
  0xaf   : > { %s853_s7 = scalar_lea.hbm %s852_s12, 8  ;;  %s857_s18 = scalar_lea.hbm %s1226_s4, 64 }
  0xb0   : > { %p854_p9 = scmp.ne.s32.totalorder %s852_s12, %s853_s7  ;;  %p858_p12 = scmp.lt.s32.totalorder %s852_s12, %s1226_s4 }
  0xb1   : > { %p859_p13 = scmp.lt.s32.totalorder %s857_s18, %s853_s7 }
  0xb2   : > { %p855_p10 = pnand %p854_p9, %p1053_p3 }
  0xb3   : > { %p860_p0 = por %p859_p13, %p858_p12 }
  0xb4   : > { %p856_p11 = pneg %p855_p10 }
  0xb6   : > { %p861_p1 = pnand %p860_p0, %p856_p11 }
  0xb8   : > { %864 = shalt.err (!%p861_p1)
}
  0xb9   : > { %s1252_s1 = sld [smem:[#allocation12_spill]]  ;;  %v442_v16 = vpop.f32.mrf.mxu2  ;;  %s1253_s9 = scalar_lea.vmem [#allocation6], %s1095_s17 }
  0xba   : > { %728 = dma.vmem_to_hbm [thread:$0]  (%p1053_p3), %s476_s14, 128, %s478_s16, %s450_s24   ;;  %448 = vst.msk [vmem:[%s1253_s9] sm:$0xff] %vm445_vm1, %v442_v16 }
  0xbb   : > { %s885_s7 = scalar_lea.hbm %s1228_s6, 64 }
  0xbf   : > { %s1254_s13 = int_to_ptr.hbm [resolvable:$true] %s1252_s1 }
  0xc0   : > { %s879_s19 = sshra.s32 %s1254_s13, 4  ;;  %s880_s19 = int_to_ptr.hbm [resolvable:$true] %s879_s19 }
  0xc1   : > { %s881_s0 = scalar_lea.hbm %s880_s19, 8  ;;  %p886_p6 = scmp.lt.s32.totalorder %s880_s19, %s1228_s6 }
  0xc2   : > { %p882_p2 = scmp.ne.s32.totalorder %s880_s19, %s881_s0  ;;  %p887_p7 = scmp.lt.s32.totalorder %s885_s7, %s881_s0 }
  0xc4   : > { %p883_p4 = pnand %p882_p2, %p1053_p3  ;;  %p888_p9 = por %p887_p7, %p886_p6 }
  0xc6   : > { %p884_p5 = pneg %p883_p4 }
  0xc8   : > { %p889_p10 = pnand %p888_p9, %p884_p5 }
  0xca   : > { %892 = shalt.err (!%p889_p10)
}
  0xcb   : > { %s1255_s17 = smov %s1254_s13  ;;  %s1256_s14 = sld [smem:[#allocation11_spill]] }
  0xd1   : > { %s1257_s16 = int_to_ptr.vmem [resolvable:$true] %s1256_s14 }
  0xd2   : > { %730 = dma.vmem_to_hbm [thread:$0]  (%p1053_p3), %s1257_s16, 128, %s1255_s17, %s455_s20  }
  0xd3 PF: > { %p744_p11 = scmp.ge.s32.totalorder %s963_s28, 2  ;;  %s523_s24 = sand.u32 1, %s935_s21  }
  0xd4   : > { %s524_s18 = scalar_lea.sflag [#allocation3], %s523_s24 }
  0xd5   : > { %p735_p12 = pnand %p744_p11, %p1064_p8 }
  0xd7   : > { %p736_p13 = pneg %p735_p12 }
  0xd9   : > { %926 = dma.done.wait (%p736_p13), %s524_s18, 128  }
  0xda   : > { %928 = vsyncadd (%p736_p13), %s524_s18, 4294967168  ;;  %s1258_s10 = sadd.s32 4294967294, %s963_s28  }
  0xdb   : > { %s533_s8 = sand.u32 1, %s1258_s10  }
  0xdc   : > { %s534_s9 = scalar_lea.sflag [#allocation5], %s533_s8 }
  0xdd   : > { %930 = dma.done.wait (%p736_p13), %s534_s9, 256  }
  0xde   : > { %932 = vsyncadd (%p736_p13), %s534_s9, 4294967040  ;;  %s23_s28 = sadd.s32 1, %s963_s28   ;;  %s1259_s11 = sld [smem:[#allocation9_spill]] }
  0xdf   : > { %p20_p3 = scmp.ge.s32.totalorder %s23_s28, 10   ;;  %s1260_s20 = sld [smem:[#allocation10_spill]] }
  0xe0   : > { %s1261_s21 = smov %s939_s22  ;;  %s1262_s22 = smov %s943_s23 }
  0xe1   : > { %s1263_s23 = smov %s1073_s15  ;;  %s1264_s24 = smov %s955_s26 }
  0xe2   : > { %s1265_s25 = smov %s959_s27  ;;  %22 = sbr.rel (!%p20_p3) target bundleno = 10 (0xa), region = 112 }
  0xe4   : > { %s1266_s26 = smov %s1259_s11 }
  0xe5   : > { %s1267_s27 = smov %s1260_s20 }
  0xe7   :  { %550 = vsyncpa [#allocation3], 1 }
  0xe8   :  { %552 = vsyncpa [#allocation3 + $0x1], 1 }
  0xe9   :  { %553 = vsyncpa [#allocation5], 1 }
  0xea   :  { %555 = vsyncpa [#allocation5 + $0x1], 1 }

</bundles_post_ra>
